<compile_context>
chip_gen: v7x
topology: tpu7x:2x2x1
jax: 0.10.0
libtpu: 0.0.40
codegen_flags: <defaults>
</compile_context>

<pallas_src>
import jax
import jax.numpy as jnp
from jax.experimental import pallas as pl
from jax.experimental.pallas import tpu as pltpu

_EMB = 10          # embedding_dim of each table
_IN = 2 * _EMB     # fc1 fan-in (user ++ movie)
_HIDDEN = 128      # fc1 width 120 zero-padded to a full lane count
_MAX_TB = 16384    # batch tile (rows); multiple of 128


def _round_up(x, m):
    return (x + m - 1) // m * m


def _choose_tiling(B):
    """Pick (tb, b_pad, nb): tb multiple of 128, padding <= ~128 rows/tile,
    and >= 2 tiles for large batches so v7x's two TensorCores split the grid."""
    b128 = _round_up(B, 128)
    if b128 <= _MAX_TB:
        return b128, b128, 1
    nb = max(2, pl.cdiv(b128, _MAX_TB))
    tb = _round_up(pl.cdiv(B, nb), 128)
    nb = pl.cdiv(B, tb)
    return tb, tb * nb, nb


def _mlp_kernel(x_ref, w1t_ref, b1_ref, w2r_ref, b2_ref, o_ref):
    """One batch tile of: relu(W1 @ [u; m] + b1)^T @ w2 + b2, batch on lanes.

    x_ref   : (20, TB)  bf16  stacked user/movie embedding columns for the tile
    w1t_ref : (128, 20) bf16  fc1 weight (hidden padded 120->128, pad rows zero)
    b1_ref  : (128, 1)  f32   fc1 bias column (pad rows zero)
    w2r_ref : (1, 128)  bf16  fc2 weight row (pad cols zero)
    b2_ref  : (1, 1)    f32   fc2 bias scalar, SMEM
    o_ref   : (1, TB)   f32   lane-dense output row for this tile
    """
    # fc1 as a single K=20 matmul: (128,20) @ (20,TB) -> (128,TB), f32 accum.
    h = jnp.dot(w1t_ref[...], x_ref[...], preferred_element_type=jnp.float32)
    h = jnp.maximum(h + b1_ref[...], 0.0)                      # bias + ReLU, f32
    # fc2: full K=128 contraction, result stays lane-dense (1, TB).
    y = jnp.dot(w2r_ref[...], h.astype(jnp.bfloat16),
                preferred_element_type=jnp.float32)            # (1, TB)
    o_ref[...] = (y + b2_ref[0, 0]).astype(o_ref.dtype)


def movielens_mlp_pallas(x, w1t, b1, w2_row, b2):
    """x: (20, B) bf16 stacked embeddings -> (B, 1) f32 via the fused MLP kernel."""
    B = x.shape[1]
    tb, b_pad, nb = _choose_tiling(B)
    if b_pad != B:
        x = jnp.pad(x, ((0, 0), (0, b_pad - B)))

    resident = lambda shape: pl.BlockSpec(shape, lambda i: (0, 0))  # stays in VMEM
    out = pl.pallas_call(
        _mlp_kernel,
        out_shape=jax.ShapeDtypeStruct((1, b_pad), jnp.float32),
        grid_spec=pltpu.PrefetchScalarGridSpec(
            num_scalar_prefetch=0,
            grid=(nb,),
            in_specs=[
                pl.BlockSpec((_IN, tb), lambda i: (0, i)),           # x tile (1 DMA)
                resident((_HIDDEN, _IN)),                            # W1^T
                resident((_HIDDEN, 1)),                              # b1 column
                resident((1, _HIDDEN)),                              # W2 row
                pl.BlockSpec(memory_space=pltpu.MemorySpace.SMEM),   # b2 scalar
            ],
            out_specs=pl.BlockSpec((1, tb), lambda i: (0, i)),
        ),
        compiler_params=pltpu.CompilerParams(
            # batch tiles are independent -> megacore-shard them on v7x
            dimension_semantics=("parallel",),
            # room for the (128, TB) f32 intermediate + double-buffered inputs,
            # still well under v7x's 64 MiB physical VMEM.
            vmem_limit_bytes=48 * 1024 * 1024,
        ),
    )(x, w1t, b1, w2_row, b2)
    return out.reshape(b_pad)[:B].reshape(B, 1)


@jax.jit
def _forward(user_tbl_t, movie_tbl_t, w1t, b1, w2_row, b2,
             user_emb_idx, movie_emb_idx):
    # TODO(synk): fuse this embedding-row gather into the Pallas kernel
    # (scalar-prefetch indices + VMEM-resident tables) to drop the (20, B)
    # HBM round-trip; kept in XLA because the in-kernel dynamic gather has no
    # robust Mosaic lowering across table sizes / chip generations.
    u = user_tbl_t[:, user_emb_idx[:, 0]]      # (10, B) — already lane-dense
    m = movie_tbl_t[:, movie_emb_idx[:, 0]]    # (10, B)
    x = jnp.concatenate([u, m], axis=0).astype(jnp.bfloat16)   # (20, B)
    return movielens_mlp_pallas(x, w1t, b1, w2_row, b2)


class MovielensModelPallas:
    """Deterministic-parameter JAX/Pallas re-implementation of movielens_model."""

    def __init__(self, num_unique_users, num_unique_movies, key):
        k = jax.random.split(key, 6)
        # nn.Embedding default init: N(0, 1). Tables stored transposed
        # (emb_dim, rows) so the gather yields the (10, B) layout the kernel eats.
        user = jax.random.normal(k[0], (num_unique_users, _EMB), jnp.float32)
        movies = jax.random.normal(k[1], (num_unique_movies, _EMB), jnp.float32)
        self.user_tbl_t = user.T                      # (10, num_users)
        self.movie_tbl_t = movies.T                   # (10, num_movies)

        # nn.Linear default init: U(-1/sqrt(fan_in), 1/sqrt(fan_in)).
        lim1 = 1.0 / jnp.sqrt(20.0)
        w1 = jax.random.uniform(k[2], (120, _IN), jnp.float32, -lim1, lim1)  # fc1.weight
        b1 = jax.random.uniform(k[3], (120,), jnp.float32, -lim1, lim1)      # fc1.bias
        lim2 = 1.0 / jnp.sqrt(120.0)
        w2 = jax.random.uniform(k[4], (1, 120), jnp.float32, -lim2, lim2)    # fc2.weight
        b2 = jax.random.uniform(k[5], (1,), jnp.float32, -lim2, lim2)        # fc2.bias

        # f32 copies for the pure-JAX reference.
        self.w1_f32, self.b1_f32, self.w2_f32, self.b2_f32 = w1, b1, w2, b2

        # Kernel operands: hidden zero-padded 120 -> 128 (padded units output
        # relu(0+0)=0 and have zero fc2 weight -> forward math unchanged);
        # matmul operands bf16, biases f32.
        pad = _HIDDEN - 120
        self.w1t = jnp.pad(w1, ((0, pad), (0, 0))).astype(jnp.bfloat16)      # (128, 20)
        self.b1 = jnp.pad(b1, (0, pad)).reshape(_HIDDEN, 1)                  # (128, 1)
        self.w2_row = jnp.pad(w2, ((0, 0), (0, pad))).astype(jnp.bfloat16)   # (1, 128)
        self.b2 = b2.reshape(1, 1)                                           # (1, 1)
        # keep the zero-pad invariant explicit
        assert (not jnp.any(self.w1t[120:]) and not jnp.any(self.b1[120:])
                and not jnp.any(self.w2_row[:, 120:]))

    def __call__(self, user_emb_idx, movie_emb_idx):
        # user_emb_idx, movie_emb_idx: (B, 1) int32
        return _forward(self.user_tbl_t, self.movie_tbl_t, self.w1t, self.b1,
                        self.w2_row, self.b2, user_emb_idx, movie_emb_idx)


def _reference_forward(model, user_emb_idx, movie_emb_idx):
    """Pure-JAX f32 reference of the PyTorch forward, for verification."""
    u = model.user_tbl_t[:, user_emb_idx[:, 0]].T       # (B, 10)
    m = model.movie_tbl_t[:, movie_emb_idx[:, 0]].T     # (B, 10)
    x = jnp.concatenate([u, m], axis=1)                 # (B, 20)
    h = jnp.maximum(x @ model.w1_f32.T + model.b1_f32, 0.0)
    return h @ model.w2_f32.T + model.b2_f32


if __name__ == "__main__":
    key = jax.random.PRNGKey(0)
    k_model, k_u, k_m = jax.random.split(key, 3)

    num_unique_users = 32
    num_unique_movies = 48
    batch = 8

    model = MovielensModelPallas(num_unique_users, num_unique_movies, k_model)

    user_emb_idx = jax.random.randint(k_u, (batch, 1), 0, num_unique_users, jnp.int32)
    movie_emb_idx = jax.random.randint(k_m, (batch, 1), 0, num_unique_movies, jnp.int32)

    out = model(user_emb_idx, movie_emb_idx)
    out = jax.block_until_ready(out)

    ref = _reference_forward(model, user_emb_idx, movie_emb_idx)
    assert out.shape == (batch, 1), out.shape
    # bf16 MXU matmuls vs f32 reference -> looser tolerance than pure-f32.
    assert jnp.allclose(out, ref, atol=3e-2, rtol=3e-2), (out, ref)

    print("KERNEL_OK")
</pallas_src>

<mosaic_0001>
module attributes {stable_mosaic.version = 11 : i64} {
  func.func @_mlp_kernel(%arg0: i32, %arg1: memref<20x128xbf16, #tpu.memory_space<vmem>>, %arg2: memref<128x20xbf16, #tpu.memory_space<vmem>>, %arg3: memref<128x1xf32, #tpu.memory_space<vmem>>, %arg4: memref<1x128xbf16, #tpu.memory_space<vmem>>, %arg5: memref<1x1xf32, #tpu.memory_space<smem>>, %arg6: memref<1x128xf32, #tpu.memory_space<vmem>>) attributes {dimension_semantics = [#tpu.dimension_semantics<parallel>], iteration_bounds = array<i64: 1>, scalar_prefetch = 0 : i64, scratch_operands = 0 : i64, tpu.core_type = #tpu.core_type<tc>, window_params = [{transform_indices = @transform_0, window_bounds = array<i64: 20, 128>}, {pipeline_mode = #tpu.pipeline_mode<synchronous>, transform_indices = @transform_1, window_bounds = array<i64: 128, 20>}, {pipeline_mode = #tpu.pipeline_mode<synchronous>, transform_indices = @transform_2, window_bounds = array<i64: 128, 1>}, {pipeline_mode = #tpu.pipeline_mode<synchronous>, transform_indices = @transform_3, window_bounds = array<i64: 1, 128>}, {transform_indices = @transform_4, window_bounds = array<i64: 1, 1>}, {transform_indices = @transform_5, window_bounds = array<i64: 1, 128>}]} {
    %c0 = arith.constant 0 : index
    %c0_0 = arith.constant 0 : index
    %0 = vector.load %arg2[%c0, %c0_0] : memref<128x20xbf16, #tpu.memory_space<vmem>>, vector<128x20xbf16>
    %c0_1 = arith.constant 0 : index
    %c0_2 = arith.constant 0 : index
    %1 = vector.load %arg1[%c0_1, %c0_2] : memref<20x128xbf16, #tpu.memory_space<vmem>>, vector<20x128xbf16>
    %cst = arith.constant dense<0.000000e+00> : vector<128x128xf32>
    %2 = tpu.matmul %0, %1, %cst {dimension_numbers = #tpu.dot_dimension_numbers<[1], [0], [0], [1], [0, 0, 1, 1], [], []>} : vector<128x20xbf16>, vector<20x128xbf16>, vector<128x128xf32> -> vector<128x128xf32>
    %c0_3 = arith.constant 0 : index
    %c0_4 = arith.constant 0 : index
    %3 = vector.load %arg3[%c0_3, %c0_4] : memref<128x1xf32, #tpu.memory_space<vmem>>, vector<128x1xf32>
    %4 = vector.broadcast %3 : vector<128x1xf32> to vector<128x128xf32>
    %5 = arith.addf %2, %4 : vector<128x128xf32>
    %cst_5 = arith.constant 0.000000e+00 : f32
    %6 = vector.broadcast %cst_5 : f32 to vector<128x128xf32>
    %7 = arith.maximumf %5, %6 : vector<128x128xf32>
    %c0_6 = arith.constant 0 : index
    %c0_7 = arith.constant 0 : index
    %8 = vector.load %arg4[%c0_6, %c0_7] : memref<1x128xbf16, #tpu.memory_space<vmem>>, vector<1x128xbf16>
    %9 = arith.truncf %7 : vector<128x128xf32> to vector<128x128xbf16>
    %cst_8 = arith.constant dense<0.000000e+00> : vector<1x128xf32>
    %10 = tpu.matmul %8, %9, %cst_8 {dimension_numbers = #tpu.dot_dimension_numbers<[1], [0], [0], [1], [0, 0, 1, 1], [], []>} : vector<1x128xbf16>, vector<128x128xbf16>, vector<1x128xf32> -> vector<1x128xf32>
    %c0_9 = arith.constant 0 : index
    %c0_10 = arith.constant 0 : index
    %11 = memref.load %arg5[%c0_9, %c0_10] : memref<1x1xf32, #tpu.memory_space<smem>>
    %12 = vector.broadcast %11 : f32 to vector<1x128xf32>
    %13 = arith.addf %10, %12 : vector<1x128xf32>
    %c0_11 = arith.constant 0 : index
    %c0_12 = arith.constant 0 : index
    %14 = vector.load %arg6[%c0_11, %c0_12] : memref<1x128xf32, #tpu.memory_space<vmem>>, vector<1x128xf32>
    tpu.vector_store %arg6[%c0_11, %c0_12], %13 {strides = array<i32>} : memref<1x128xf32, #tpu.memory_space<vmem>>, vector<1x128xf32>,
    return
  }
  func.func @transform_0(%arg0: i32) -> (i32, i32) {
    %c0_i32 = arith.constant 0 : i32
    %c0_i32_0 = arith.constant 0 : i32
    return %c0_i32, %arg0 : i32, i32
  }
  func.func @transform_1(%arg0: i32) -> (i32, i32) {
    %c0_i32 = arith.constant 0 : i32
    %c0_i32_0 = arith.constant 0 : i32
    %c0_i32_1 = arith.constant 0 : i32
    return %c0_i32, %c0_i32_0 : i32, i32
  }
  func.func @transform_2(%arg0: i32) -> (i32, i32) {
    %c0_i32 = arith.constant 0 : i32
    %c0_i32_0 = arith.constant 0 : i32
    %c0_i32_1 = arith.constant 0 : i32
    return %c0_i32, %c0_i32_0 : i32, i32
  }
  func.func @transform_3(%arg0: i32) -> (i32, i32) {
    %c0_i32 = arith.constant 0 : i32
    %c0_i32_0 = arith.constant 0 : i32
    %c0_i32_1 = arith.constant 0 : i32
    return %c0_i32, %c0_i32_0 : i32, i32
  }
  func.func @transform_4(%arg0: i32) -> (i32, i32) {
    %c0_i32 = arith.constant 0 : i32
    %c0_i32_0 = arith.constant 0 : i32
    %c0_i32_1 = arith.constant 0 : i32
    return %c0_i32, %c0_i32_0 : i32, i32
  }
  func.func @transform_5(%arg0: i32) -> (i32, i32) {
    %c0_i32 = arith.constant 0 : i32
    %c0_i32_0 = arith.constant 0 : i32
    return %c0_i32, %arg0 : i32, i32
  }
}

</mosaic_0001>

<bundles_post_ra>
// kernel: _forward.1
= control target key start
LH: loop header
LB: loop body
LE: loop exit
PB: predicated region body
PF: predicated region fallthrough
CT: control target
= control target key end

     0   :  { %vm186_vm0 = vcmask 162816   ;;  %v477_v0 = vmov 0   ;;  %vm211_vm1 = vcmask 1041408   ;;  %v478_v28 = vmov 0.0   ;;  %s614_s0 = inlined_call_operand.vmem [shape: bf16[20,128], index: 0, kind: input, shape index: {}]   ;;  %s615_s1 = inlined_call_operand.vmem [shape: bf16[128,20], index: 1, kind: input, shape index: {}]   ;;  %s616_s2 = inlined_call_operand.vmem [shape: f32[128,1], index: 2, kind: input, shape index: {}]   ;;  %s617_s3 = inlined_call_operand.vmem [shape: bf16[1,128], index: 3, kind: input, shape index: {}]   ;;  %s618_s4 = inlined_call_operand.<no memory space> [shape: f32[1,1], index: 4, kind: input, shape index: {}]   ;;  %s619_s5 = inlined_call_operand.vmem [shape: f32[1,128], index: 5, kind: output, shape index: {}]  }
   0x1   :  { %465 = vset.pattern.permute.xlu0 %v477_v0  ;;  %466 = vset.pattern.permute.xlu1 %v477_v0  ;;  %v467_v1 = vld [vmem:[%s614_s0] sm:$0xff]   ;;  %v468_v2 = vld [vmem:[%s614_s0 + $0x8] ss:$0 sps:$4 sm:$0x33]   ;;  %v471_v6 = vld [vmem:[%s615_s1 + $0x10] sm:$0xff]   ;;  %vm479_vm2 = vmmov 0  }
   0x2   :  { %v469_v3 = vld [vmem:[%s615_s1] sm:$0xff]   ;;  %421 = vmatprep.subr.bf16.mxu0 %v467_v1  ;;  %v213_v4 = vsel %vm211_vm1, %v468_v2, 0  ;;  %v470_v5 = vld [vmem:[%s615_s1 + $0x8] sm:$0xff]   ;;  %v43_v8 = vld [vmem:[%s616_s2 + $0x10] sm:$0xff]  ;;  %441 = vmatprep.subr.bf16.mxu1 %v478_v28 }
   0x3   :  { %422 = vmatpush3.bf16.msra.mxu0 %v467_v1  ;;  %425 = vmatprep.mubr.msk.bf16.mxu0 %vm186_vm0, %v469_v3  ;;  %v41_v7 = vld [vmem:[%s616_s2] sm:$0xff]  ;;  %v42_v9 = vld [vmem:[%s616_s2 + $0x8] sm:$0xff]  ;;  %v44_v10 = vld [vmem:[%s616_s2 + $0x18] sm:$0xff] }
   0x4   :  { %461 = vmatprep.subr.msk.bf16.mxu0 %vm211_vm1, %v468_v2  ;;  %59 = vperm.xlu0 %465, %v41_v7   ;;  %v472_v11 = vld [vmem:[%s615_s1 + $0x18] sm:$0xff]   ;;  %v45_v12 = vld [vmem:[%s616_s2 + $0x20] sm:$0xff]  ;;  %v46_v14 = vld [vmem:[%s616_s2 + $0x28] sm:$0xff] }
   0x5   :  { %69 = vperm.xlu1 %466, %v43_v8   ;;  %v473_v13 = vld [vmem:[%s615_s1 + $0x20] sm:$0xff]   ;;  %v47_v15 = vld [vmem:[%s616_s2 + $0x30] sm:$0xff]  ;;  %v48_v16 = vld [vmem:[%s616_s2 + $0x38] sm:$0xff]  ;;  %457 = vmatprep.mubr.msk.bf16.mxu1 %vm479_vm2, %v478_v28 }
   0x6   :  { %v474_v17 = vld [vmem:[%s615_s1 + $0x28] sm:$0xff]   ;;  %v49_v18 = vld [vmem:[%s616_s2 + $0x40] sm:$0xff]  ;;  %v475_v19 = vld [vmem:[%s615_s1 + $0x30] sm:$0xff]  }
   0x7   :  { %424 = vmatpush3.bf16.msra.mxu0 %v213_v4  ;;  %v50_v20 = vld [vmem:[%s616_s2 + $0x48] sm:$0xff]  ;;  %v51_v21 = vld [vmem:[%s616_s2 + $0x50] sm:$0xff]  ;;  %v52_v22 = vld [vmem:[%s616_s2 + $0x58] sm:$0xff] }
   0x8   :  { %64 = vperm.xlu0 %465, %v42_v9   ;;  %v476_v23 = vld [vmem:[%s615_s1 + $0x38] sm:$0xff]   ;;  %v53_v24 = vld [vmem:[%s616_s2 + $0x60] sm:$0xff]  ;;  %v54_v25 = vld [vmem:[%s616_s2 + $0x68] sm:$0xff] }
   0x9   :  { %74 = vperm.xlu1 %466, %v44_v10   ;;  %v55_v26 = vld [vmem:[%s616_s2 + $0x70] sm:$0xff]  ;;  %v56_v27 = vld [vmem:[%s616_s2 + $0x78] sm:$0xff] }
   0xa   :  { %426 = vmatmul.mubr.msk.bf16.vlgmr.msra.gmra.mrb[0].mxu0 %vm186_vm0, %v470_v5 }
   0xb   :  { %429 = vmatprep.mubr.msk.bf16.mxu0 %vm186_vm0, %v471_v6 }
   0xc   :  { %79 = vperm.xlu0 %465, %v45_v12  }
   0xd   :  { %84 = vperm.xlu1 %466, %v46_v14  }
  0x10   :  { %89 = vperm.xlu0 %465, %v47_v15  }
  0x11   :  { %94 = vperm.xlu1 %466, %v48_v16  }
  0x12   :  { %430 = vmatmul.mubr.msk.bf16.gmra.mrb[4].mxu0 %vm186_vm0, %v472_v11 }
  0x13   :  { %433 = vmatprep.mubr.msk.bf16.mxu0 %vm186_vm0, %v473_v13 }
  0x14   :  { %99 = vperm.xlu0 %465, %v49_v18  }
  0x15   :  { %104 = vperm.xlu1 %466, %v50_v20  }
  0x18   :  { %109 = vperm.xlu0 %465, %v51_v21  }
  0x19   :  { %114 = vperm.xlu1 %466, %v52_v22  }
  0x1a   :  { %434 = vmatmul.mubr.msk.bf16.gmra.mrb[8].mxu0 %vm186_vm0, %v474_v17 }
  0x1b   :  { %437 = vmatprep.mubr.msk.bf16.mxu0 %vm186_vm0, %v475_v19 }
  0x1c   :  { %119 = vperm.xlu0 %465, %v53_v24  }
  0x1d   :  { %124 = vperm.xlu1 %466, %v54_v25  }
  0x20   :  { %129 = vperm.xlu0 %465, %v55_v26  }
  0x21   :  { %134 = vperm.xlu1 %466, %v56_v27  }
  0x22   :  { %438 = vmatmul.mubr.msk.bf16.gmra.mrb[12].mxu0 %vm186_vm0, %v476_v23 }
  0x83   :  { %v60_v29 = vpop.permute.xlu0 %59 }
  0x84   :  { %v70_v30 = vpop.permute.xlu1 %69 }
  0x87   :  { %v65_v31 = vpop.permute.xlu0 %64 }
  0x88   :  { %v75_v32 = vpop.permute.xlu1 %74 }
  0x8b   :  { %v80_v33 = vpop.permute.xlu0 %79 }
  0x8c   :  { %v85_v34 = vpop.permute.xlu1 %84 }
  0x8f   :  { %v90_v35 = vpop.permute.xlu0 %89 }
  0x90   :  { %v95_v39 = vpop.permute.xlu1 %94 }
  0x93   :  { %v100_v47 = vpop.permute.xlu0 %99 }
  0x94   :  { %v105_v51 = vpop.permute.xlu1 %104 }
  0x97   :  { %v110_v60 = vpop.permute.xlu0 %109 }
  0x98   :  { %v115_v0 = vpop.permute.xlu1 %114 }
  0x9b   :  { %v120_v8 = vpop.permute.xlu0 %119 }
  0x9c   :  { %v125_v13 = vpop.permute.xlu1 %124 }
  0x9f   :  { %v130_v20 = vpop.permute.xlu0 %129 }
  0xa0   :  { %v135_v25 = vpop.permute.xlu1 %134 }
  0xdd   :  { %v427_v36 = vpop.f32.mrb[0].mxu0 }
  0xde   :  { %v258_v37 = vadd.f32 %v427_v36, %v70_v30  ;;  %v249_v38 = vpop.f32.mrb[1].mxu0 }
  0xdf   :  { %v250_v40 = vadd.f32 %v249_v38, %v60_v29  ;;  %v428_v41 = vpop.f32.mrb[2].mxu0  ;;  %v328_v38 = vld [vmem:[%s617_s3] sm:$0x1] }
  0xe0   :  { %v261_v42 = vadd.f32 %v428_v41, %v75_v32  ;;  %v252_v43 = vpop.f32.mrb[3].mxu0  ;;  %v314_v45 = vmax.f32 %v258_v37, 0.0 }
  0xe1   :  { %v253_v44 = vadd.f32 %v252_v43, %v65_v31  ;;  %v312_v48 = vmax.f32 %v250_v40, 0.0 }
  0xe2   :  { %v315_v46 = vmax.f32 %v261_v42, 0.0 }
  0xe3   :  { %v313_v49 = vmax.f32 %v253_v44, 0.0 }
  0xe4   :  { %v330_v50 = vpack.c.bf16 %v315_v46, %v314_v45 }
  0xe5   :  { %v431_v52 = vpop.f32.mrb[4].mxu0  ;;  %v329_v53 = vpack.c.bf16 %v313_v49, %v312_v48 }
  0xe6   :  { %v274_v54 = vadd.f32 %v431_v52, %v90_v35  ;;  %v265_v55 = vpop.f32.mrb[5].mxu0 }
  0xe7   :  { %v266_v56 = vadd.f32 %v265_v55, %v80_v33  ;;  %v432_v57 = vpop.f32.mrb[6].mxu0  ;;  %442 = vmatpush3.bf16.msra.mxu1 %v329_v53 }
  0xe8   :  { %v277_v58 = vadd.f32 %v432_v57, %v95_v39  ;;  %v268_v59 = vpop.f32.mrb[7].mxu0  ;;  %443 = vmatprep.subr.bf16.mxu1 %v478_v28  ;;  %v318_v62 = vmax.f32 %v274_v54, 0.0  ;;  %v338_v39 = vstv %s618_s4 }
  0xe9   :  { %v269_v61 = vadd.f32 %v268_v59, %v85_v34  ;;  %v316_v1 = vmax.f32 %v266_v56, 0.0 }
  0xea   :  { %v319_v63 = vmax.f32 %v277_v58, 0.0 }
  0xeb   :  { %v317_v2 = vmax.f32 %v269_v61, 0.0  ;;  %444 = vmatpush3.bf16.msra.mxu1 %v330_v50 }
  0xec   :  { %v332_v3 = vpack.c.bf16 %v319_v63, %v318_v62  ;;  %445 = vmatprep.subr.bf16.mxu1 %v478_v28 }
  0xed   :  { %v331_v4 = vpack.c.bf16 %v317_v2, %v316_v1  ;;  %v435_v5 = vpop.f32.mrb[8].mxu0 }
  0xee   :  { %v290_v6 = vadd.f32 %v435_v5, %v110_v60  ;;  %v281_v7 = vpop.f32.mrb[9].mxu0 }
  0xef   :  { %v282_v9 = vadd.f32 %v281_v7, %v100_v47  ;;  %v436_v10 = vpop.f32.mrb[10].mxu0  ;;  %446 = vmatpush3.bf16.msra.mxu1 %v331_v4 }
  0xf0   :  { %v293_v11 = vadd.f32 %v436_v10, %v115_v0  ;;  %v284_v12 = vpop.f32.mrb[11].mxu0  ;;  %447 = vmatprep.subr.bf16.mxu1 %v478_v28  ;;  %v322_v15 = vmax.f32 %v290_v6, 0.0 }
  0xf1   :  { %v285_v14 = vadd.f32 %v284_v12, %v105_v51  ;;  %v320_v17 = vmax.f32 %v282_v9, 0.0 }
  0xf2   :  { %v323_v16 = vmax.f32 %v293_v11, 0.0 }
  0xf3   :  { %v321_v18 = vmax.f32 %v285_v14, 0.0  ;;  %448 = vmatpush3.bf16.msra.mxu1 %v332_v3 }
  0xf4   :  { %v334_v19 = vpack.c.bf16 %v323_v16, %v322_v15  ;;  %449 = vmatprep.subr.bf16.mxu1 %v478_v28 }
  0xf5   :  { %v333_v21 = vpack.c.bf16 %v321_v18, %v320_v17  ;;  %v439_v22 = vpop.f32.mrb[12].mxu0 }
  0xf6   :  { %v306_v23 = vadd.f32 %v439_v22, %v130_v20  ;;  %v297_v24 = vpop.f32.mrb[13].mxu0 }
  0xf7   :  { %v298_v26 = vadd.f32 %v297_v24, %v120_v8  ;;  %v440_v27 = vpop.f32.mrb[14].mxu0  ;;  %450 = vmatpush3.bf16.msra.mxu1 %v333_v21 }
  0xf8   :  { %v309_v29 = vadd.f32 %v440_v27, %v135_v25  ;;  %v300_v30 = vpop.f32.mrb[15].mxu0  ;;  %451 = vmatprep.subr.bf16.mxu1 %v478_v28  ;;  %v326_v32 = vmax.f32 %v306_v23, 0.0 }
  0xf9   :  { %v301_v31 = vadd.f32 %v300_v30, %v125_v13  ;;  %v324_v34 = vmax.f32 %v298_v26, 0.0 }
  0xfa   :  { %v327_v33 = vmax.f32 %v309_v29, 0.0 }
  0xfb   :  { %v325_v35 = vmax.f32 %v301_v31, 0.0  ;;  %452 = vmatpush3.bf16.msra.mxu1 %v334_v19 }
  0xfc   :  { %v336_v36 = vpack.c.bf16 %v327_v33, %v326_v32  ;;  %453 = vmatprep.subr.bf16.mxu1 %v478_v28 }
  0xfd   :  { %v335_v37 = vpack.c.bf16 %v325_v35, %v324_v34 }
  0xff   :  { %454 = vmatpush3.bf16.msra.mxu1 %v335_v37 }
 0x100   :  { %455 = vmatprep.subr.bf16.mxu1 %v478_v28 }
 0x103   :  { %456 = vmatpush3.bf16.msra.mxu1 %v336_v36 }
 0x106   :  { %458 = vmatmul.mubr.bf16.vlgmr.msra.gmra.mrb[0].mxu1 %v328_v38 }
 0x1d9   :  { %v373_v40 = vpop.f32.mrb[0].mxu1 }
 0x1da   :  { %v374_v41 = vadd.f32 %v373_v40, %v338_v39  ;;  %v459_v42 = vpop.f32.mrb[1].mxu1 }
 0x1db   :  { %v376_v43 = vpop.f32.mrb[2].mxu1 }
 0x1dc   :  { %379 = vst [vmem:[%s619_s5] sm:$0x1] %v374_v41  ;;  %v460_v44 = vpop.f32.mrb[3].mxu1 }

</bundles_post_ra>
